<compile_context>
chip_gen: v7x
topology: tpu7x:2x2x1
jax: 0.10.0
libtpu: 0.0.40
codegen_flags: <defaults>
</compile_context>

<pallas_src>
import math

import jax
import jax.numpy as jnp
from jax.experimental import pallas as pl
from jax.experimental.pallas import tpu as pltpu

EPSILON = 1e-9
LOG_EPSILON = float(math.log(EPSILON))
LAMBDA_CONST = 100.0

# v6e/v7x XLU-relief option: keep the sample*context product packed bf16 through
# the 128-lane reduce (halves XLU vreg passes, accepts bf16 partial adds).
# Default False = f32-accumulated reduce (numerically safe); flip only if a
# bundle dump shows the XLU slot binding before HBM.
PACKED_BF16_REDUCE = False


def _log_sigmoid(x):
    # log(sigmoid(x)) = min(x, 0) - log(1 + exp(-|x|)); 2 EUP ops, no overflow.
    return jnp.minimum(x, 0.0) - jnp.log(1.0 + jnp.exp(-jnp.abs(x)))


def lda2vec_loss_kernel(doc_w_ref, topic_ref, pivot_ref, samples_ref,
                        sign_ref, w_ref, neg_ref, dir_ref,
                        acc_neg_ref, acc_dir_ref):
    # NOTE: accumulator init/finalize is tied to the *innermost* grid axis (1),
    # which must stay the "arbitrary" reduction axis. Axis 0 ("parallel") owns
    # one output block + scratch instance per slice, so the re-zero at step==0
    # is correct whether or not axis 0 is sharded across TensorCores.
    step = pl.program_id(1)

    @pl.when(step == 0)
    def _init():
        acc_neg_ref[...] = jnp.zeros_like(acc_neg_ref)
        acc_dir_ref[...] = jnp.zeros_like(acc_dir_ref)

    doc_w = doc_w_ref[...]                          # (BT, T) f32
    w = w_ref[...]                                  # (BT, 1) f32 (already /sum)
    bt, n_topics = doc_w.shape

    # --- topic proportions & document vectors (dropouts = eval identity) ---
    m = jnp.max(doc_w, axis=1, keepdims=True)       # (BT, 1)
    e = jnp.exp(doc_w - m)                          # (BT, T)
    denom = jnp.sum(e, axis=1, keepdims=True)       # (BT, 1)
    props = e / denom                               # (BT, T)

    doc_vectors = jnp.dot(props.astype(jnp.bfloat16), topic_ref[...],
                          preferred_element_type=jnp.float32)       # (BT, Dp)
    context = doc_vectors + pivot_ref[...].astype(jnp.float32)      # (BT, Dp) f32
    context_bf = context.astype(jnp.bfloat16)                       # cast once

    # --- fused target(+1) / noise(-1) negative-sampling term ---
    sign = sign_ref[...]                            # (1, Np) f32 in {+1,-1,0}
    prod = samples_ref[...] * context_bf[:, None, :]                # bf16 multiply
    if PACKED_BF16_REDUCE:
        s = jnp.sum(prod, axis=-1).astype(jnp.float32)              # packed bf16 reduce
    else:
        s = jnp.sum(prod, axis=-1, dtype=jnp.float32)               # f32 accumulate
    term = jnp.abs(sign) * jnp.maximum(_log_sigmoid(sign * s),
                                       LOG_EPSILON)                 # (BT, Np)

    # Per-step accumulate: fold the batch axis in whole-vreg groups of 8 rows
    # (plain VPU adds), one tiny lane reduce, masked single-lane add; the final
    # scalar reduce happens only in the finalize branch.
    wterm = term * w                                                # (BT, Np)
    part_neg = wterm.reshape(bt // 8, 8, -1).sum(axis=0)            # (8, Np)
    acc_neg_ref[:, :1] += jnp.sum(part_neg, axis=1, keepdims=True)  # (8, 1)

    # --- dirichlet term: sum_t log_softmax = sum_t(doc_w) - T * logsumexp ---
    lse = m + jnp.log(denom)                                        # (BT, 1)
    row_sum = jnp.sum(doc_w, axis=1, keepdims=True) \
        - jnp.float32(n_topics) * lse                               # (BT, 1)
    wrow = w * row_sum                                              # (BT, 1)
    acc_dir_ref[:, :1] += wrow.reshape(bt // 8, 8, 1).sum(axis=0)   # (8, 1)

    @pl.when(step == pl.num_programs(1) - 1)
    def _finalize():
        dir_scale = jnp.float32(LAMBDA_CONST * (1.0 - 1.0 / n_topics))
        neg_tot = jnp.sum(acc_neg_ref[...], keepdims=True)          # (1, 1)
        dir_tot = jnp.sum(acc_dir_ref[...], keepdims=True)          # (1, 1)
        # Lane-dense unmasked (8,128) stores; every element carries the partial.
        neg_ref[...] = jnp.broadcast_to(-neg_tot, neg_ref.shape)
        dir_ref[...] = jnp.broadcast_to(dir_tot * dir_scale, dir_ref.shape)


def _vmem_capacity_bytes():
    try:
        cap = int(pltpu.get_tpu_info().vmem_capacity_bytes)
        if cap > 0:
            return cap
    except Exception:
        pass
    try:
        kind = jax.devices()[0].device_kind.lower()
    except Exception:
        kind = ""
    if any(t in kind for t in ("v4", "v5", "v6")):
        return 128 * 1024 * 1024
    return 64 * 1024 * 1024          # v7x-conservative default


def _num_tensorcores():
    try:
        info = pltpu.get_tpu_info()
        for attr in ("num_cores", "core_count", "num_tensorcores",
                     "tensorcore_count"):
            v = getattr(info, attr, None)
            if isinstance(v, int) and 0 < v <= 8:
                return v
    except Exception:
        pass
    try:
        kind = jax.devices()[0].device_kind.lower()
    except Exception:
        kind = ""
    # Megacore chips (2 TensorCores behind one device): v4 / v5p / v7x.
    # v5e / v6e are single-core: a degenerate size-1 "parallel" axis, no extra steps.
    if any(t in kind for t in ("v4", "v5p", "7")):
        return 2
    return 1


def _choose_batch_tile(B, Np, Dp, T, ncores, budget_bytes):
    """Largest multiple-of-8 batch tile whose double-buffered bf16 sample blocks
    plus compiler temps fit the per-generation VMEM budget."""
    fixed = (2 * T * Dp * 2          # resident topic block (bf16)
             + 2 * Np * 4            # resident sign row
             + 2 * 8 * 128 * 4       # accumulators
             + 4 * 8 * 128 * 4       # output blocks
             + (64 << 10))           # slack
    per_row = (Np * Dp * (2 * 2                              # samples: 2 bf16 buffers
                          + 2                                # bf16 product temp
                          + (0 if PACKED_BF16_REDUCE else 4))  # f32 reduce temp
               + Dp * (2 * 2 + 4 + 2 + 4)   # pivot (2x bf16) + context f32/bf16 + doc_vec
               + Np * 4 * 4                 # (BT, Np) f32 score/term temps
               + T * 4 * 4                  # doc_w + softmax temps
               + 64)
    avail = max(budget_bytes - fixed, per_row * 8)
    bt = max(8, min(1024, (avail // per_row) // 8 * 8))
    rows_per_core = -(-B // ncores)
    rows_per_core = max(8, -(-rows_per_core // 8) * 8)
    return min(bt, rows_per_core)


def lda2vec_loss_pallas(doc_w, topic_vectors, pivot_vectors,
                        sample_vectors, sample_signs, w_col):
    """doc_w (B,T); topic_vectors (T,D); pivot_vectors (B,D);
    sample_vectors (B, N, D) with N = W*(S+1) ([target | noise] per window slot);
    sample_signs (N,) in {+1,-1}; w_col (B,1) raw per-doc loss weights."""
    f32, bf16 = jnp.float32, jnp.bfloat16
    B, T = doc_w.shape
    N = sample_vectors.shape[1]
    D = topic_vectors.shape[1]
    Dp = ((D + 127) // 128) * 128
    Np = ((N + 15) // 16) * 16       # dense bf16 sublane packing for the big tile
    pad_d, pad_n = Dp - D, Np - N

    # Global w normalization stays in XLA; .mean()'s 1/B cancels the module's *B.
    w_f = w_col.astype(f32).reshape(B, 1)
    w_scaled = w_f / jnp.sum(w_f)

    doc_w_p = doc_w.astype(f32)
    topic_p = jnp.pad(topic_vectors.astype(bf16), ((0, 0), (0, pad_d)))
    pivot_p = jnp.pad(pivot_vectors.astype(bf16), ((0, 0), (0, pad_d)))
    samples_p = jnp.pad(sample_vectors.astype(bf16),
                        ((0, 0), (0, pad_n), (0, pad_d)))
    sign_p = jnp.pad(sample_signs.astype(f32), (0, pad_n)).reshape(1, Np)

    ncores = _num_tensorcores()
    vmem_cap = _vmem_capacity_bytes()
    budget = (3 * vmem_cap) // 8     # 24 MiB on v7x, 48 MiB on v5e/v6e
    vmem_limit = vmem_cap // 2       # 32 MiB on v7x, 64 MiB on v5e/v6e
    BT = _choose_batch_tile(B, Np, Dp, T, ncores, budget)
    nb = max(1, -(-B // (ncores * BT)))
    Bp = ncores * BT * nb
    pad_b = Bp - B
    if pad_b:
        # Padded rows carry w == 0 (and zero vectors) -> contribute exactly nothing.
        doc_w_p = jnp.pad(doc_w_p, ((0, pad_b), (0, 0)))
        pivot_p = jnp.pad(pivot_p, ((0, pad_b), (0, 0)))
        samples_p = jnp.pad(samples_p, ((0, pad_b), (0, 0), (0, 0)))
        w_scaled = jnp.pad(w_scaled, ((0, pad_b), (0, 0)))

    in_specs = [
        pl.BlockSpec((BT, T), lambda c, i, nb=nb: (c * nb + i, 0)),
        pl.BlockSpec((T, Dp), lambda c, i: (0, 0)),                 # resident
        pl.BlockSpec((BT, Dp), lambda c, i, nb=nb: (c * nb + i, 0)),
        # TODO(synk): on v7x, sweep pipeline_mode=pl.Buffered(3) here if the
        # noise DMA wait becomes exposed after the compute fixes.
        pl.BlockSpec((BT, Np, Dp), lambda c, i, nb=nb: (c * nb + i, 0, 0)),
        pl.BlockSpec((1, Np), lambda c, i: (0, 0)),                 # resident
        pl.BlockSpec((BT, 1), lambda c, i, nb=nb: (c * nb + i, 0)),
    ]
    out_specs = (pl.BlockSpec((8, 128), lambda c, i: (c, 0)),
                 pl.BlockSpec((8, 128), lambda c, i: (c, 0)))
    out_shape = (jax.ShapeDtypeStruct((ncores * 8, 128), f32),
                 jax.ShapeDtypeStruct((ncores * 8, 128), f32))

    inputs = (doc_w_p, topic_p, pivot_p, samples_p, sign_p, w_scaled)
    bytes_accessed = sum(int(a.size) * a.dtype.itemsize for a in inputs) \
        + 2 * ncores * 8 * 128 * 4
    cost = pl.CostEstimate(
        flops=int(2 * Bp * Np * Dp + 2 * Bp * T * Dp),
        transcendentals=int(Bp * (T + 2 * Np + 2)),
        bytes_accessed=int(bytes_accessed))

    neg_out, dir_out = pl.pallas_call(
        lda2vec_loss_kernel,
        out_shape=out_shape,
        grid_spec=pltpu.PrefetchScalarGridSpec(
            num_scalar_prefetch=0,
            grid=(ncores, nb),
            in_specs=in_specs,
            out_specs=out_specs,
            scratch_shapes=[pltpu.VMEM((8, 128), f32),
                            pltpu.VMEM((8, 128), f32)]),
        compiler_params=pltpu.CompilerParams(
            # TODO(synk): confirm on v7x (xprof per-core occupancy) that the
            # leading "parallel" axis lands on both TensorCores; otherwise move
            # to an explicit pl.core_map over pltpu.create_tensorcore_mesh.
            dimension_semantics=("parallel", "arbitrary"),
            vmem_limit_bytes=int(vmem_limit)),
        cost_estimate=cost,
    )(*inputs)

    # One 8x128 partial block per core slice; element [c*8, 0] carries the value.
    neg_loss = jnp.sum(neg_out[::8, 0])
    dirichlet_loss = jnp.sum(dir_out[::8, 0])
    return neg_loss, dirichlet_loss


def lda2vec_loss_reference(doc_w, topic_vectors, pivot, targets, noise, w_raw):
    B, T = doc_w.shape
    w = w_raw[:, 0] / w_raw.sum() * B
    props = jax.nn.softmax(doc_w, axis=1)
    context = props @ topic_vectors + pivot
    s_t = (targets * context[:, None, :]).sum(-1)
    log_targets = jnp.log(jnp.maximum(jax.nn.sigmoid(s_t), EPSILON))
    s_n = (noise * context[:, None, None, :]).sum(-1)
    sls = jnp.log(jnp.maximum(jax.nn.sigmoid(-s_n), EPSILON)).sum(-1)
    neg = -(w * (log_targets + sls).sum(1)).mean()
    lsm = jax.nn.log_softmax(doc_w, axis=1)
    dirich = (w * lsm.sum(1)).mean() * LAMBDA_CONST * (1.0 - 1.0 / T)
    return neg, dirich


if __name__ == "__main__":
    # Small, module-consistent shapes (num_sampled = 15 is the module default;
    # W*(S+1) = 64 packs densely in bf16 sublanes).
    B = 8           # batch_size
    W = 4           # window_size
    S = 15          # num_sampled
    T = 16          # n_topics
    D = 32          # embedding_dim
    VOCAB = 64      # vocab_size
    NDOCS = 16      # n_documents

    key = jax.random.PRNGKey(0)
    keys = jax.random.split(key, 9)

    # Deterministic parameter init (matches __init__ shapes).
    doc_weights_emb = 0.1 * jax.random.normal(keys[0], (NDOCS, T), jnp.float32)
    topic_vectors = jax.random.normal(keys[1], (T, D), jnp.float32)
    word_vectors = jax.random.normal(keys[2], (VOCAB, D), jnp.float32)
    unigram = jax.nn.softmax(jax.random.normal(keys[3], (VOCAB,), jnp.float32))
    loss_doc_weights = 0.5 + jax.random.uniform(keys[4], (NDOCS,), jnp.float32)

    # Forward inputs.
    doc_indices = jax.random.randint(keys[5], (B,), 0, NDOCS, jnp.int32)
    pivot_words = jax.random.randint(keys[6], (B,), 0, VOCAB, jnp.int32)
    target_words = jax.random.randint(keys[7], (B, W), 0, VOCAB, jnp.int32)

    # Glue (outside the kernel): embedding gathers + negative sampling.
    # TODO(synk): AliasMultinomial alias-method sampler has no clean Pallas
    # equivalent; jax.random.categorical over the unigram distribution instead.
    noise_idx = jax.random.categorical(keys[8], jnp.log(unigram), shape=(B, W, S))

    doc_w = doc_weights_emb[doc_indices]                       # (B, T)
    w_col = loss_doc_weights[doc_indices].reshape(B, 1)        # (B, 1)
    pivot_vecs = word_vectors[pivot_words]                     # (B, D)

    # Fold the positive target in as one extra sample with sign +1 (single
    # gather -> one dense (B, W*(S+1), D) tile instead of two padded tensors).
    sample_idx = jnp.concatenate([target_words[:, :, None], noise_idx], axis=2)
    sample_vecs = word_vectors[sample_idx].reshape(B, W * (S + 1), D)
    sample_signs = jnp.concatenate(
        [jnp.ones((W, 1), jnp.float32), -jnp.ones((W, S), jnp.float32)],
        axis=1).reshape(W * (S + 1))

    neg_loss, dirichlet_loss = lda2vec_loss_pallas(
        doc_w, topic_vectors, pivot_vecs, sample_vecs, sample_signs, w_col)
    neg_loss = jax.block_until_ready(neg_loss)
    dirichlet_loss = jax.block_until_ready(dirichlet_loss)

    # Reference on the same bf16-quantized embeddings the kernel consumes
    # (isolates kernel math from the intentional bf16 HBM quantization).
    pivot_q = pivot_vecs.astype(jnp.bfloat16).astype(jnp.float32)
    target_q = word_vectors[target_words].astype(jnp.bfloat16).astype(jnp.float32)
    noise_q = word_vectors[noise_idx].astype(jnp.bfloat16).astype(jnp.float32)
    ref_neg, ref_dir = lda2vec_loss_reference(
        doc_w, topic_vectors, pivot_q, target_q, noise_q, w_col)

    assert jnp.allclose(neg_loss, ref_neg, rtol=1e-2, atol=1e-1), (neg_loss, ref_neg)
    assert jnp.allclose(dirichlet_loss, ref_dir, rtol=1e-2, atol=1e-1), (dirichlet_loss, ref_dir)

    print("KERNEL_OK")
</pallas_src>

<mosaic_0001>
module attributes {stable_mosaic.version = 11 : i64} {
  func.func @lda2vec_loss_kernel(%arg0: i32, %arg1: i32, %arg2: memref<8x16xf32, #tpu.memory_space<vmem>>, %arg3: memref<16x128xbf16, #tpu.memory_space<vmem>>, %arg4: memref<8x128xbf16, #tpu.memory_space<vmem>>, %arg5: memref<8x64x128xbf16, #tpu.memory_space<vmem>>, %arg6: memref<1x64xf32, #tpu.memory_space<vmem>>, %arg7: memref<8x1xf32, #tpu.memory_space<vmem>>, %arg8: memref<8x128xf32, #tpu.memory_space<vmem>>, %arg9: memref<8x128xf32, #tpu.memory_space<vmem>>, %arg10: memref<8x128xf32, #tpu.memory_space<vmem>>, %arg11: memref<8x128xf32, #tpu.memory_space<vmem>>) attributes {dimension_semantics = [#tpu.dimension_semantics<parallel>, #tpu.dimension_semantics<arbitrary>], iteration_bounds = array<i64: 1, 1>, scalar_prefetch = 0 : i64, scratch_operands = 2 : i64, tpu.core_type = #tpu.core_type<tc>, window_params = [{transform_indices = @transform_0, window_bounds = array<i64: 8, 16>}, {pipeline_mode = #tpu.pipeline_mode<synchronous>, transform_indices = @transform_1, window_bounds = array<i64: 16, 128>}, {transform_indices = @transform_2, window_bounds = array<i64: 8, 128>}, {transform_indices = @transform_3, window_bounds = array<i64: 8, 64, 128>}, {pipeline_mode = #tpu.pipeline_mode<synchronous>, transform_indices = @transform_4, window_bounds = array<i64: 1, 64>}, {transform_indices = @transform_5, window_bounds = array<i64: 8, 1>}, {transform_indices = @transform_6, window_bounds = array<i64: 8, 128>}, {transform_indices = @transform_7, window_bounds = array<i64: 8, 128>}]} {
    %c0_i32 = arith.constant 0 : i32
    %0 = arith.cmpi eq, %arg1, %c0_i32 : i32
    %1 = arith.extui %0 : i1 to i32
    %c0_i32_0 = arith.constant 0 : i32
    %2 = arith.cmpi ne, %1, %c0_i32_0 : i32
    scf.if %2 {
      %cst_35 = arith.constant 0.000000e+00 : f32
      %70 = vector.broadcast %cst_35 : f32 to vector<8x128xf32>
      %c0_36 = arith.constant 0 : index
      %c0_37 = arith.constant 0 : index
      %71 = vector.load %arg10[%c0_36, %c0_37] : memref<8x128xf32, #tpu.memory_space<vmem>>, vector<8x128xf32>
      tpu.vector_store %arg10[%c0_36, %c0_37], %70 {strides = array<i32>} : memref<8x128xf32, #tpu.memory_space<vmem>>, vector<8x128xf32>,
      %cst_38 = arith.constant 0.000000e+00 : f32
      %72 = vector.broadcast %cst_38 : f32 to vector<8x128xf32>
      %c0_39 = arith.constant 0 : index
      %c0_40 = arith.constant 0 : index
      %73 = vector.load %arg11[%c0_39, %c0_40] : memref<8x128xf32, #tpu.memory_space<vmem>>, vector<8x128xf32>
      tpu.vector_store %arg11[%c0_39, %c0_40], %72 {strides = array<i32>} : memref<8x128xf32, #tpu.memory_space<vmem>>, vector<8x128xf32>,
    } else {
    }
    %c0 = arith.constant 0 : index
    %c0_1 = arith.constant 0 : index
    %3 = vector.load %arg2[%c0, %c0_1] : memref<8x16xf32, #tpu.memory_space<vmem>>, vector<8x16xf32>
    %c0_2 = arith.constant 0 : index
    %c0_3 = arith.constant 0 : index
    %4 = vector.load %arg7[%c0_2, %c0_3] : memref<8x1xf32, #tpu.memory_space<vmem>>, vector<8x1xf32>
    %cst = arith.constant dense<0xFF800000> : vector<8xf32>
    %5 = vector.multi_reduction <maximumf>, %3, %cst [1] : vector<8x16xf32> to vector<8xf32>
    %6 = vector.shape_cast %5 : vector<8xf32> to vector<8x1xf32>
    %7 = vector.broadcast %6 : vector<8x1xf32> to vector<8x16xf32>
    %8 = arith.subf %3, %7 : vector<8x16xf32>
    %9 = math.exp %8 : vector<8x16xf32>
    %cst_4 = arith.constant dense<0.000000e+00> : vector<8xf32>
    %10 = vector.multi_reduction <add>, %9, %cst_4 [1] : vector<8x16xf32> to vector<8xf32>
    %11 = vector.shape_cast %10 : vector<8xf32> to vector<8x1xf32>
    %12 = vector.broadcast %11 : vector<8x1xf32> to vector<8x16xf32>
    %13 = arith.divf %9, %12 : vector<8x16xf32>
    %14 = arith.truncf %13 : vector<8x16xf32> to vector<8x16xbf16>
    %c0_5 = arith.constant 0 : index
    %c0_6 = arith.constant 0 : index
    %15 = vector.load %arg3[%c0_5, %c0_6] : memref<16x128xbf16, #tpu.memory_space<vmem>>, vector<16x128xbf16>
    %cst_7 = arith.constant dense<0.000000e+00> : vector<8x128xf32>
    %16 = tpu.matmul %14, %15, %cst_7 {dimension_numbers = #tpu.dot_dimension_numbers<[1], [0], [0], [1], [0, 0, 1, 1], [], []>} : vector<8x16xbf16>, vector<16x128xbf16>, vector<8x128xf32> -> vector<8x128xf32>
    %c0_8 = arith.constant 0 : index
    %c0_9 = arith.constant 0 : index
    %17 = vector.load %arg4[%c0_8, %c0_9] : memref<8x128xbf16, #tpu.memory_space<vmem>>, vector<8x128xbf16>
    %18 = arith.extf %17 : vector<8x128xbf16> to vector<8x128xf32>
    %19 = arith.addf %16, %18 : vector<8x128xf32>
    %20 = arith.truncf %19 : vector<8x128xf32> to vector<8x128xbf16>
    %c0_10 = arith.constant 0 : index
    %c0_11 = arith.constant 0 : index
    %21 = vector.load %arg6[%c0_10, %c0_11] : memref<1x64xf32, #tpu.memory_space<vmem>>, vector<1x64xf32>
    %c0_12 = arith.constant 0 : index
    %c0_13 = arith.constant 0 : index
    %c0_14 = arith.constant 0 : index
    %22 = vector.load %arg5[%c0_12, %c0_13, %c0_14] : memref<8x64x128xbf16, #tpu.memory_space<vmem>>, vector<8x64x128xbf16>
    %23 = vector.shape_cast %20 : vector<8x128xbf16> to vector<8x1x128xbf16>
    %24 = vector.broadcast %23 : vector<8x1x128xbf16> to vector<8x64x128xbf16>
    %25 = arith.mulf %22, %24 : vector<8x64x128xbf16>
    %26 = arith.extf %25 : vector<8x64x128xbf16> to vector<8x64x128xf32>
    %cst_15 = arith.constant dense<0.000000e+00> : vector<8x64xf32>
    %27 = vector.multi_reduction <add>, %26, %cst_15 [2] : vector<8x64x128xf32> to vector<8x64xf32>
    %28 = math.absf %21 : vector<1x64xf32>
    %29 = vector.broadcast %21 : vector<1x64xf32> to vector<8x64xf32>
    %30 = arith.mulf %29, %27 : vector<8x64xf32>
    %cst_16 = arith.constant 0.000000e+00 : f32
    %31 = vector.broadcast %cst_16 : f32 to vector<8x64xf32>
    %32 = arith.minimumf %30, %31 : vector<8x64xf32>
    %33 = math.absf %30 : vector<8x64xf32>
    %cst_17 = arith.constant 0.000000e+00 : f32
    %34 = vector.broadcast %cst_17 : f32 to vector<8x64xf32>
    %35 = arith.subf %34, %33 : vector<8x64xf32>
    %36 = math.exp %35 : vector<8x64xf32>
    %cst_18 = arith.constant 1.000000e+00 : f32
    %37 = vector.broadcast %cst_18 : f32 to vector<8x64xf32>
    %38 = arith.addf %37, %36 : vector<8x64xf32>
    %39 = math.log %38 : vector<8x64xf32>
    %40 = arith.subf %32, %39 : vector<8x64xf32>
    %cst_19 = arith.constant -20.7232666 : f32
    %41 = vector.broadcast %cst_19 : f32 to vector<8x64xf32>
    %42 = arith.maximumf %40, %41 : vector<8x64xf32>
    %43 = vector.broadcast %28 : vector<1x64xf32> to vector<8x64xf32>
    %44 = arith.mulf %43, %42 : vector<8x64xf32>
    %45 = vector.broadcast %4 : vector<8x1xf32> to vector<8x64xf32>
    %46 = arith.mulf %44, %45 : vector<8x64xf32>
    %47 = vector.shape_cast %46 : vector<8x64xf32> to vector<1x8x64xf32>
    %cst_20 = arith.constant dense<0.000000e+00> : vector<8x64xf32>
    %48 = vector.multi_reduction <add>, %47, %cst_20 [0] : vector<1x8x64xf32> to vector<8x64xf32>
    %c0_21 = arith.constant 0 : index
    %c0_22 = arith.constant 0 : index
    %49 = vector.load %arg10[%c0_21, %c0_22] : memref<8x128xf32, #tpu.memory_space<vmem>>, vector<8x1xf32>
    %cst_23 = arith.constant dense<0.000000e+00> : vector<8xf32>
    %50 = vector.multi_reduction <add>, %48, %cst_23 [1] : vector<8x64xf32> to vector<8xf32>
    %51 = vector.shape_cast %50 : vector<8xf32> to vector<8x1xf32>
    %52 = arith.addf %49, %51 : vector<8x1xf32>
    %c0_24 = arith.constant 0 : index
    %c0_25 = arith.constant 0 : index
    %53 = vector.load %arg10[%c0_24, %c0_25] : memref<8x128xf32, #tpu.memory_space<vmem>>, vector<8x1xf32>
    tpu.vector_store %arg10[%c0_24, %c0_25], %52 {strides = array<i32>} : memref<8x128xf32, #tpu.memory_space<vmem>>, vector<8x1xf32>,
    %54 = math.log %11 : vector<8x1xf32>
    %55 = arith.addf %6, %54 : vector<8x1xf32>
    %cst_26 = arith.constant dense<0.000000e+00> : vector<8xf32>
    %56 = vector.multi_reduction <add>, %3, %cst_26 [1] : vector<8x16xf32> to vector<8xf32>
    %57 = vector.shape_cast %56 : vector<8xf32> to vector<8x1xf32>
    %cst_27 = arith.constant 1.600000e+01 : f32
    %58 = vector.broadcast %cst_27 : f32 to vector<8x1xf32>
    %59 = arith.mulf %58, %55 : vector<8x1xf32>
    %60 = arith.subf %57, %59 : vector<8x1xf32>
    %61 = arith.mulf %4, %60 : vector<8x1xf32>
    %c0_28 = arith.constant 0 : index
    %c0_29 = arith.constant 0 : index
    %62 = vector.load %arg11[%c0_28, %c0_29] : memref<8x128xf32, #tpu.memory_space<vmem>>, vector<8x1xf32>
    %63 = vector.shape_cast %61 : vector<8x1xf32> to vector<1x8x1xf32>
    %cst_30 = arith.constant dense<0.000000e+00> : vector<8x1xf32>
    %64 = vector.multi_reduction <add>, %63, %cst_30 [0] : vector<1x8x1xf32> to vector<8x1xf32>
    %65 = arith.addf %62, %64 : vector<8x1xf32>
    %c0_31 = arith.constant 0 : index
    %c0_32 = arith.constant 0 : index
    %66 = vector.load %arg11[%c0_31, %c0_32] : memref<8x128xf32, #tpu.memory_space<vmem>>, vector<8x1xf32>
    tpu.vector_store %arg11[%c0_31, %c0_32], %65 {strides = array<i32>} : memref<8x128xf32, #tpu.memory_space<vmem>>, vector<8x1xf32>,
    %c0_i32_33 = arith.constant 0 : i32
    %67 = arith.cmpi eq, %arg1, %c0_i32_33 : i32
    %68 = arith.extui %67 : i1 to i32
    %c0_i32_34 = arith.constant 0 : i32
    %69 = arith.cmpi ne, %68, %c0_i32_34 : i32
    scf.if %69 {
      %c0_35 = arith.constant 0 : index
      %c0_36 = arith.constant 0 : index
      %70 = vector.load %arg10[%c0_35, %c0_36] : memref<8x128xf32, #tpu.memory_space<vmem>>, vector<8x128xf32>
      %71 = vector.shape_cast %70 : vector<8x128xf32> to vector<1x8x128xf32>
      %cst_37 = arith.constant dense<0.000000e+00> : vector<1xf32>
      %72 = vector.multi_reduction <add>, %71, %cst_37 [1, 2] : vector<1x8x128xf32> to vector<1xf32>
      %73 = vector.shape_cast %72 : vector<1xf32> to vector<1x1x1xf32>
      %74 = vector.extract %73[0, 0, 0] : f32 from vector<1x1x1xf32>
      %75 = vector.broadcast %74 : f32 to vector<1x1xf32>
      %c0_38 = arith.constant 0 : index
      %c0_39 = arith.constant 0 : index
      %76 = vector.load %arg11[%c0_38, %c0_39] : memref<8x128xf32, #tpu.memory_space<vmem>>, vector<8x128xf32>
      %77 = vector.shape_cast %76 : vector<8x128xf32> to vector<1x8x128xf32>
      %cst_40 = arith.constant dense<0.000000e+00> : vector<1xf32>
      %78 = vector.multi_reduction <add>, %77, %cst_40 [1, 2] : vector<1x8x128xf32> to vector<1xf32>
      %79 = vector.shape_cast %78 : vector<1xf32> to vector<1x1x1xf32>
      %80 = vector.extract %79[0, 0, 0] : f32 from vector<1x1x1xf32>
      %81 = vector.broadcast %80 : f32 to vector<1x1xf32>
      %cst_41 = arith.constant 0.000000e+00 : f32
      %82 = vector.broadcast %cst_41 : f32 to vector<1x1xf32>
      %83 = arith.subf %82, %75 : vector<1x1xf32>
      %84 = vector.shape_cast %83 : vector<1x1xf32> to vector<1x1xf32>
      %85 = vector.broadcast %84 : vector<1x1xf32> to vector<8x128xf32>
      %c0_42 = arith.constant 0 : index
      %c0_43 = arith.constant 0 : index
      %86 = vector.load %arg8[%c0_42, %c0_43] : memref<8x128xf32, #tpu.memory_space<vmem>>, vector<8x128xf32>
      tpu.vector_store %arg8[%c0_42, %c0_43], %85 {strides = array<i32>} : memref<8x128xf32, #tpu.memory_space<vmem>>, vector<8x128xf32>,
      %cst_44 = arith.constant 9.375000e+01 : f32
      %87 = vector.broadcast %cst_44 : f32 to vector<1x1xf32>
      %88 = arith.mulf %81, %87 : vector<1x1xf32>
      %89 = vector.shape_cast %88 : vector<1x1xf32> to vector<1x1xf32>
      %90 = vector.broadcast %89 : vector<1x1xf32> to vector<8x128xf32>
      %c0_45 = arith.constant 0 : index
      %c0_46 = arith.constant 0 : index
      %91 = vector.load %arg9[%c0_45, %c0_46] : memref<8x128xf32, #tpu.memory_space<vmem>>, vector<8x128xf32>
      tpu.vector_store %arg9[%c0_45, %c0_46], %90 {strides = array<i32>} : memref<8x128xf32, #tpu.memory_space<vmem>>, vector<8x128xf32>,
    } else {
    }
    return
  }
  func.func @transform_0(%arg0: i32, %arg1: i32) -> (i32, i32) {
    %c1_i32 = arith.constant 1 : i32
    %0 = arith.muli %arg0, %c1_i32 : i32
    %1 = arith.addi %0, %arg1 : i32
    %c0_i32 = arith.constant 0 : i32
    %c0_i32_0 = arith.constant 0 : i32
    return %1, %c0_i32 : i32, i32
  }
  func.func @transform_1(%arg0: i32, %arg1: i32) -> (i32, i32) {
    %c0_i32 = arith.constant 0 : i32
    %c0_i32_0 = arith.constant 0 : i32
    %c0_i32_1 = arith.constant 0 : i32
    return %c0_i32, %c0_i32_0 : i32, i32
  }
  func.func @transform_2(%arg0: i32, %arg1: i32) -> (i32, i32) {
    %c1_i32 = arith.constant 1 : i32
    %0 = arith.muli %arg0, %c1_i32 : i32
    %1 = arith.addi %0, %arg1 : i32
    %c0_i32 = arith.constant 0 : i32
    %c0_i32_0 = arith.constant 0 : i32
    return %1, %c0_i32 : i32, i32
  }
  func.func @transform_3(%arg0: i32, %arg1: i32) -> (i32, i32, i32) {
    %c1_i32 = arith.constant 1 : i32
    %0 = arith.muli %arg0, %c1_i32 : i32
    %1 = arith.addi %0, %arg1 : i32
    %c0_i32 = arith.constant 0 : i32
    %c0_i32_0 = arith.constant 0 : i32
    %c0_i32_1 = arith.constant 0 : i32
    return %1, %c0_i32, %c0_i32_0 : i32, i32, i32
  }
  func.func @transform_4(%arg0: i32, %arg1: i32) -> (i32, i32) {
    %c0_i32 = arith.constant 0 : i32
    %c0_i32_0 = arith.constant 0 : i32
    %c0_i32_1 = arith.constant 0 : i32
    return %c0_i32, %c0_i32_0 : i32, i32
  }
  func.func @transform_5(%arg0: i32, %arg1: i32) -> (i32, i32) {
    %c1_i32 = arith.constant 1 : i32
    %0 = arith.muli %arg0, %c1_i32 : i32
    %1 = arith.addi %0, %arg1 : i32
    %c0_i32 = arith.constant 0 : i32
    %c0_i32_0 = arith.constant 0 : i32
    return %1, %c0_i32 : i32, i32
  }
  func.func @transform_6(%arg0: i32, %arg1: i32) -> (i32, i32) {
    %c0_i32 = arith.constant 0 : i32
    %c0_i32_0 = arith.constant 0 : i32
    return %arg0, %c0_i32 : i32, i32
  }
  func.func @transform_7(%arg0: i32, %arg1: i32) -> (i32, i32) {
    %c0_i32 = arith.constant 0 : i32
    %c0_i32_0 = arith.constant 0 : i32
    return %arg0, %c0_i32 : i32, i32
  }
}

</mosaic_0001>

<bundles_post_ra>
// kernel: tpu_custom_call.1
= control target key start
LH: loop header
LB: loop body
LE: loop exit
PB: predicated region body
PF: predicated region fallthrough
CT: control target
= control target key end

     0   :  { %13 = vsyncpa [#allocation5], 0  ;;  %s1749_s0 = inlined_call_operand.vmem [shape: f32[8,16], index: 0, kind: input, shape index: {}]   ;;  %s1750_s1 = inlined_call_operand.hbm [shape: bf16[16,128], index: 1, kind: input, shape index: {}]   ;;  %s1751_s2 = inlined_call_operand.vmem [shape: bf16[8,128], index: 2, kind: input, shape index: {}]   ;;  %s1752_s3 = inlined_call_operand.hbm [shape: bf16[8,64,128], index: 3, kind: input, shape index: {}]   ;;  %s1753_s4 = inlined_call_operand.vmem [shape: f32[1,64], index: 4, kind: input, shape index: {}]   ;;  %s1754_s5 = inlined_call_operand.vmem [shape: f32[8,1], index: 5, kind: input, shape index: {}]   ;;  %s1755_s6 = inlined_call_operand.hbm [shape: f32[8,128], index: 6, kind: output, shape index: {0}]   ;;  %s1756_s7 = inlined_call_operand.hbm [shape: f32[8,128], index: 7, kind: output, shape index: {1}]  }
   0x1   :  { %14 = vsyncpa [#allocation8], 0 }
   0x2   :  { %15 = vsyncpa [#allocation6], 0 }
   0x3   :  { %16 = vsyncpa [#allocation11], 0  ;;  %s1353_s24 = smov [#allocation4]   ;;  %s1257_s28 = scalar_lea.hbm %s1750_s1, 128 }
   0x4   :  { %s30_s25 = sshll.u32 %s1353_s24, 4  ;;  %p1258_p0 = scmp.ne.s32.totalorder %s1750_s1, %s1257_s28  ;;  %s31_s25 = int_to_ptr.vmem [resolvable:$true] %s30_s25 }
   0x5   :  { %p1261_p1 = scmp.lt.u32.totalorder %s1257_s28, %s1750_s1 }
   0x7   :  { %p1263_p2 = pnand %p1261_p1, %p1258_p0 }
   0x9   :  { %1266 = shalt.err (!%p1263_p2)
}
   0xa   :  { %s1267_s10 = scalar_lea.vmem %s31_s25, 128  ;;  %p1272_p4 = scmp.lt.s32.totalorder %s31_s25, %s31_s25 }
   0xb   :  { %p1268_p3 = scmp.ne.s32.totalorder %s31_s25, %s1267_s10  ;;  %p1273_p5 = scmp.lt.s32.totalorder %s1267_s10, %s1267_s10 }
   0xd   :  { %p1274_p6 = por %p1273_p5, %p1272_p4 }
   0xf   :  { %p1275_p7 = pnand %p1274_p6, %p1268_p3 }
  0x11   :  { %1278 = shalt.err (!%p1275_p7)
}
  0x12   :  { %s1354_s11 = smov 64   ;;  %s1355_s12 = smov 4  }
  0x13   :  { %36 = dma.hbm_to_vmem [thread:$0]  %s1750_s1, 128, %s31_s25, [#allocation5], %s1354_s11, %s1354_s11, %s1355_s12  }
  0x14   :  { %s1356_s15 = smov [#allocation7]   ;;  %s1279_s19 = scalar_lea.hbm %s1752_s3, 4096 }
  0x15   :  { %s55_s16 = sshll.u32 %s1356_s15, 4  ;;  %p1280_p8 = scmp.ne.s32.totalorder %s1752_s3, %s1279_s19  ;;  %s56_s16 = int_to_ptr.vmem [resolvable:$true] %s55_s16 }
  0x16   :  { %p1283_p9 = scmp.lt.u32.totalorder %s1279_s19, %s1752_s3 }
  0x18   :  { %p1285_p10 = pnand %p1283_p9, %p1280_p8 }
  0x1a   :  { %1288 = shalt.err (!%p1285_p10)
}
  0x1b   :  { %s1289_s24 = scalar_lea.vmem %s56_s16, 4096  ;;  %p1294_p12 = scmp.lt.s32.totalorder %s56_s16, %s56_s16 }
  0x1c   :  { %p1290_p11 = scmp.ne.s32.totalorder %s56_s16, %s1289_s24  ;;  %p1295_p13 = scmp.lt.s32.totalorder %s1289_s24, %s1289_s24 }
  0x1e   :  { %p1296_p0 = por %p1295_p13, %p1294_p12 }
  0x20   :  { %p1297_p1 = pnand %p1296_p0, %p1290_p11 }
  0x22   :  { %1300 = shalt.err (!%p1297_p1)
}
  0x23   :  { %61 = dma.hbm_to_vmem [thread:$0]  %s1752_s3, 4096, %s56_s16, [#allocation8], %s1354_s11, %s1354_s11, %s1355_s12  }
  0x24   :  { %1345 = dma.done.wait [#allocation5], 128  }
  0x25   :  { %1346 = vsyncadd [#allocation5], 4294967168 }
  0x26   :  { %1347 = dma.done.wait [#allocation8], 4096  }
  0x27   :  { %1348 = vsyncadd [#allocation8], 4294963200  ;;  %vm122_vm0 = vcmask 130048   ;;  %v1430_v0 = vld [vmem:[%s1749_s0] sm:$0xff]  ;;  %v1245_v7 = vld [vmem:[#allocation4] sm:$0xff]   ;;  %v1357_v8 = vmov 0.0   ;;  %v258_v15 = vlaneseq }
  0x28   :  { %v123_v1 = vsel %vm122_vm0, %v1430_v0, -inf  ;;  %118 = vst [vmem:[#allocation2] sm:$0xff] %v1357_v8  ;;  %119 = vst [vmem:[#allocation3] sm:$0xff] %v1357_v8  ;;  %1224 = vmatprep.subr.bf16.mxu0 %v1357_v8  ;;  %vm1358_vm1 = vmmov 0   ;;  %v1359_v13 = vmov 1966171168  }
  0x29   :  { %124 = vmax.xlane.f32.xlu0 %v123_v1  ;;  %1225 = vmatpush3.bf16.msra.mxu0 %v1245_v7  ;;  %v256_v14 = vunpack.c.l.s4 %v1359_v13  ;;  %v137_v16 = vld [vmem:[%s1751_s2] sm:$0xf]  ;;  %v1447_v19 = vshrl.u32 %v258_v15, 7  ;;  %v190_v42 = vld [vmem:[#allocation7] sm:$0xf]  ;;  %vm753_vm2 = vcmask 130112  }
  0x2a   :  { %1226 = vmatprep.mubr.msk.bf16.mxu0 %vm1358_vm1, %v1357_v8  ;;  %v138_v17 = vunpack.c.l.bf16 %v137_v16  ;;  %v192_v39 = vld [vmem:[#allocation7 + $0x8] sm:$0xf]  ;;  %v193_v43 = vld [vmem:[#allocation7 + $0xc] sm:$0xf]  ;;  %v191_v46 = vld [vmem:[#allocation7 + $0x4] sm:$0xf] }
  0x2b   :  { %v257_v18 = vunpack.c.0.s8 %v256_v14  ;;  %v1451_v29 = vsub.s32 0, %v1447_v19  ;;  %v196_v51 = vld [vmem:[#allocation7 + $0x18] sm:$0xf]  ;;  %v194_v55 = vld [vmem:[#allocation7 + $0x10] sm:$0xf]  ;;  %vm760_vm3 = vcmask 195712  }
  0x2c   :  { %v197_v60 = vld [vmem:[#allocation7 + $0x1c] sm:$0xf]  ;;  %v195_v1 = vld [vmem:[#allocation7 + $0x14] sm:$0xf]  ;;  %v198_v7 = vld [vmem:[#allocation7 + $0x20] sm:$0xf] }
  0x2d   :  { %v260_v22 = vsub.s32 %v257_v18, %v1447_v19  ;;  %vm767_vm4 = vcmask 261312   ;;  %vm774_vm5 = vcmask 326912   ;;  %vm781_vm6 = vcmask 392512   ;;  %s1362_s9 = smov [#allocation10]  }
  0x2e   :  { %vm788_vm7 = vcmask 458112   ;;  %vm795_vm8 = vcmask 523712   ;;  %vm1070_vm9 = vcmask 1041409   ;;  %vm1072_vm10 = vcmask 1042434   ;;  %s1176_s10 = sshll.u32 %s1362_s9, 4  ;;  %s1177_s10 = int_to_ptr.vmem [resolvable:$true] %s1176_s10 }
  0x2f   :  { %vm1074_vm11 = vcmask 1043459   ;;  %vm1076_vm12 = vcmask 1044484   ;;  %vm1078_vm13 = vcmask 1045509   ;;  %vm1080_vm14 = vcmask 1046534  }
  0x30   :  { %vm1082_vm15 = vcmask 1047559   ;;  %vm1111_vm1 = vcmask 523264  }
  0xb6   :  { %v1434_v2 = vpop.xlane.xlu0 %124 }
  0xb7   :  { %v126_v3 = vsub.f32 %v1430_v0, %v1434_v2 }
  0xb9   :  { %v127_v4 = vmul.f32 1.442695, %v126_v3 }
  0xbb   :  { %1246 = vpow2.f32 %v127_v4 }
  0xc5   :  { %v1247_v5 = vpop.eup %1246 }
  0xc6   :  { %v129_v6 = vsel %vm122_vm0, %v1247_v5, 0.0 }
  0xc7   :  { %130 = vadd.xlane.f32.xlu0 %v129_v6 }
 0x154   :  { %v1439_v9 = vpop.xlane.xlu0 %130 }
 0x155   :  { %1248 = vrcp.f32 %v1439_v9 }
 0x156   :  { %1250 = vlog2.f32 %v1439_v9 }
 0x15f   :  { %v1249_v10 = vpop.eup %1248 }
 0x160   :  { %v133_v11 = vmul.f32 %v1249_v10, %v1247_v5 }
 0x162   :  { %v134_v12 = vpack.c.bf16 %v133_v11, %v133_v11  ;;  %v199_v11 = vld [vmem:[#allocation7 + $0x24] sm:$0xf] }
 0x164   :  { %1227 = vmatmul.mubr.msk.bf16.vlgmr.msra.gmra.mrb[0].mxu0 %vm122_vm0, %v134_v12 }
 0x237   :  { %v182_v20 = vpop.f32.mrb[0].mxu0 }
 0x238   :  { %v183_v21 = vadd.f32 %v182_v20, %v138_v17  ;;  %v1228_v23 = vpop.f32.mrb[1].mxu0  ;;  %v206_v17 = vld [vmem:[#allocation7 + $0x40] sm:$0xf] }
 0x239   :  { %v185_v24 = vpop.f32.mrb[2].mxu0 }
 0x23a   :  { %v188_v25 = vpack.c.bf16 %v183_v21, %v183_v21  ;;  %v1229_v26 = vpop.f32.mrb[3].mxu0  ;;  %v200_v21 = vld [vmem:[#allocation7 + $0x28] sm:$0xf] }
 0x23c   :  { %v261_v27 = vrot.slane %v188_v25, %v260_v22  ;;  %v208_v25 = vld [vmem:[#allocation7 + $0x48] sm:$0xf] }
 0x23e   :  { %v269_v28 = vrot.slane %v261_v27, %v260_v22  ;;  %v262_v30 = vcombine.high %v261_v27, %v261_v27 }
 0x240   :  { %v1210_v31 = vpack.i.b16 %v269_v28, %v269_v28  ;;  %v280_v32 = vunpack.i.h.s16 %v269_v28  ;;  %v1454_v34 = vrot.slane %v262_v30, %v260_v22  ;;  %v1461_v54 = vcombine.high %v269_v28, %v269_v28  ;;  %v207_v28 = vld [vmem:[#allocation7 + $0x44] sm:$0xf] }
 0x242   :  { %v298_v33 = vrot.slane %v1210_v31, %v1451_v29  ;;  %v288_v35 = vpack.i.b16 %v280_v32, %v280_v32  ;;  %v1211_v38 = vpack.i.b16 %v1454_v34, %v1454_v34  ;;  %v1212_v63 = vpack.i.b16 %v1461_v54, %v1461_v54 }
 0x244   :  { %v328_v36 = vpack.i.b16 %v298_v33, %v298_v33  ;;  %v302_v40 = vrot.slane %v288_v35, %v1451_v29  ;;  %v306_v45 = vrot.slane %v1211_v38, %v1451_v29  ;;  %v314_v12 = vrot.slane %v1212_v63, %v1451_v29  ;;  %v202_v33 = vld [vmem:[#allocation7 + $0x30] sm:$0xf] }
 0x246   :  { %v333_v37 = vrot.slane %v328_v36, %v1451_v29  ;;  %v335_v47 = vpack.i.b16 %v302_v40, %v302_v40  ;;  %v342_v57 = vpack.i.b16 %v306_v45, %v306_v45  ;;  %v356_v22 = vpack.i.b16 %v314_v12, %v314_v12  ;;  %v204_v12 = vld [vmem:[#allocation7 + $0x38] sm:$0xf] }
 0x248   :  { %v1214_v41 = vcombine.low %v333_v37, %v333_v37  ;;  %v340_v56 = vrot.slane %v335_v47, %v1451_v29  ;;  %v347_v3 = vrot.slane %v342_v57, %v1451_v29  ;;  %v361_v30 = vrot.slane %v356_v22, %v1451_v29  ;;  %v201_v37 = vld [vmem:[#allocation7 + $0x2c] sm:$0xf]  ;;  %v203_v47 = vld [vmem:[#allocation7 + $0x34] sm:$0xf]  ;;  %v210_v57 = vld [vmem:[#allocation7 + $0x50] sm:$0xf] }
 0x24a   :  { %v417_v44 = vmul.bf16 %v1214_v41, %v192_v39  ;;  %v415_v49 = vmul.bf16 %v1214_v41, %v190_v42  ;;  %v418_v50 = vmul.bf16 %v1214_v41, %v193_v43  ;;  %v416_v53 = vmul.bf16 %v1214_v41, %v191_v46 }
 0x24b   :  { %v421_v59 = vmul.bf16 %v1214_v41, %v196_v51  ;;  %v419_v62 = vmul.bf16 %v1214_v41, %v194_v55  ;;  %v1467_v4 = vcombine.low %v340_v56, %v340_v56  ;;  %v422_v6 = vmul.bf16 %v1214_v41, %v197_v60 }
 0x24c   :  { %v481_v48 = vunpack.c.l.bf16 %v417_v44  ;;  %v479_v52 = vunpack.c.l.bf16 %v415_v49  ;;  %v482_v58 = vunpack.c.l.bf16 %v418_v50  ;;  %v480_v61 = vunpack.c.l.bf16 %v416_v53  ;;  %v209_v44 = vld [vmem:[#allocation7 + $0x4c] sm:$0xf]  ;;  %v222_v50 = vld [vmem:[#allocation7 + $0x80] sm:$0xf]  ;;  %v211_v53 = vld [vmem:[#allocation7 + $0x54] sm:$0xf] }
 0x24d   :  { %v485_v5 = vunpack.c.l.bf16 %v421_v59  ;;  %v483_v8 = vunpack.c.l.bf16 %v419_v62  ;;  %v420_v10 = vmul.bf16 %v1214_v41, %v195_v1  ;;  %v1470_v13 = vcombine.low %v347_v3, %v347_v3  ;;  %v223_v41 = vld [vmem:[#allocation7 + $0x84] sm:$0xf]  ;;  %v224_v1 = vld [vmem:[#allocation7 + $0x88] sm:$0xf] }
 0x24e   :  { %547 = vadd.xlane.f32.xlu0 %v481_v48  ;;  %543 = vadd.xlane.f32.xlu1 %v479_v52  ;;  %v486_v14 = vunpack.c.l.bf16 %v422_v6  ;;  %v423_v16 = vmul.bf16 %v1467_v4, %v198_v7  ;;  %v424_v20 = vmul.bf16 %v1467_v4, %v199_v11  ;;  %v425_v27 = vmul.bf16 %v1467_v4, %v200_v21  ;;  %v212_v7 = vld [vmem:[#allocation7 + $0x58] sm:$0xf] }
 0x24f   :  { %v484_v18 = vunpack.c.l.bf16 %v420_v10  ;;  %v431_v24 = vmul.bf16 %v1470_v13, %v206_v17  ;;  %v433_v32 = vmul.bf16 %v1470_v13, %v208_v25  ;;  %v432_v36 = vmul.bf16 %v1470_v13, %v207_v28 }
 0x250   :  { %v487_v23 = vunpack.c.l.bf16 %v423_v16  ;;  %v488_v26 = vunpack.c.l.bf16 %v424_v20  ;;  %v489_v35 = vunpack.c.l.bf16 %v425_v27  ;;  %v1479_v38 = vcombine.low %v361_v30, %v361_v30 }
 0x251   :  { %v495_v31 = vunpack.c.l.bf16 %v431_v24  ;;  %v497_v39 = vunpack.c.l.bf16 %v433_v32  ;;  %v427_v40 = vmul.bf16 %v1467_v4, %v202_v33  ;;  %v496_v42 = vunpack.c.l.bf16 %v432_v36 }
 0x252   :  { %549 = vadd.xlane.f32.xlu0 %v482_v58  ;;  %545 = vadd.xlane.f32.xlu1 %v480_v61  ;;  %v426_v43 = vmul.bf16 %v1467_v4, %v201_v37  ;;  %v448_v46 = vmul.bf16 %v1479_v38, %v223_v41  ;;  %v434_v49 = vmul.bf16 %v1470_v13, %v209_v44  ;;  %v282_v58 = vunpack.i.h.s16 %v1454_v34  ;;  %v225_v61 = vld [vmem:[#allocation7 + $0x8c] sm:$0xf]  ;;  %v229_v37 = vld [vmem:[#allocation7 + $0x9c] sm:$0xf] }
 0x253   :  { %v491_v45 = vunpack.c.l.bf16 %v427_v40  ;;  %v428_v52 = vmul.bf16 %v1467_v4, %v203_v47  ;;  %v447_v56 = vmul.bf16 %v1479_v38, %v222_v50  ;;  %v436_v60 = vmul.bf16 %v1470_v13, %v211_v53 }
 0x254   :  { %v490_v48 = vunpack.c.l.bf16 %v426_v43  ;;  %v512_v51 = vunpack.c.l.bf16 %v448_v46  ;;  %v498_v55 = vunpack.c.l.bf16 %v434_v49  ;;  %v435_v63 = vmul.bf16 %v1470_v13, %v210_v57  ;;  %v214_v49 = vld [vmem:[#allocation7 + $0x60] sm:$0xf]  ;;  %v231_v57 = vld [vmem:[#allocation7 + $0xa4] sm:$0xf] }
 0x255   :  { %v492_v59 = vunpack.c.l.bf16 %v428_v52  ;;  %v511_v62 = vunpack.c.l.bf16 %v447_v56  ;;  %v290_v3 = vpack.i.b16 %v282_v58, %v282_v58  ;;  %v450_v6 = vmul.bf16 %v1479_v38, %v225_v61  ;;  %v216_v52 = vld [vmem:[#allocation7 + $0x68] sm:$0xf]  ;;  %v217_v61 = vld [vmem:[#allocation7 + $0x6c] sm:$0xf] }
 0x256   :  { %555 = vadd.xlane.f32.xlu0 %v485_v5  ;;  %551 = vadd.xlane.f32.xlu1 %v483_v8  ;;  %v500_v5 = vunpack.c.l.bf16 %v436_v60  ;;  %v284_v8 = vunpack.i.h.s16 %v1461_v54  ;;  %v499_v10 = vunpack.c.l.bf16 %v435_v63  ;;  %v449_v11 = vmul.bf16 %v1479_v38, %v224_v1  ;;  %v218_v1 = vld [vmem:[#allocation7 + $0x70] sm:$0xf] }
 0x257   :  { %v514_v16 = vunpack.c.l.bf16 %v450_v6  ;;  %v437_v17 = vmul.bf16 %v1470_v13, %v212_v7  ;;  %v429_v22 = vmul.bf16 %v1467_v4, %v204_v12  ;;  %v1501_v32 = vcombine.high %v1454_v34, %v1454_v34  ;;  %v230_v7 = vld [vmem:[#allocation7 + $0xa0] sm:$0xf] }
 0x258   :  { %v292_v20 = vpack.i.b16 %v284_v8, %v284_v8  ;;  %v513_v21 = vunpack.c.l.bf16 %v449_v11  ;;  %v454_v44 = vmul.bf16 %v1479_v38, %v229_v37  ;;  %v1360_v58 = vmov 0   ;;  %v232_v11 = vld [vmem:[#allocation7 + $0xa8] sm:$0xf] }
 0x259   :  { %v501_v54 = vunpack.c.l.bf16 %v437_v17  ;;  %v493_v28 = vunpack.c.l.bf16 %v429_v22  ;;  %1244 = vset.pattern.permute.xlu0 %v1360_v58  ;;  %v238_v17 = vld [vmem:[#allocation7 + $0xc0] sm:$0xf] }
 0x25a   :  { %557 = vadd.xlane.f32.xlu0 %v486_v14  ;;  %553 = vadd.xlane.f32.xlu1 %v484_v18  ;;  %v310_v14 = vrot.slane %v290_v3, %v1451_v29  ;;  %v226_v18 = vld [vmem:[#allocation7 + $0x90] sm:$0xf]  ;;  %v318_v27 = vrot.slane %v292_v20, %v1451_v29  ;;  %v518_v50 = vunpack.c.l.bf16 %v454_v44 }
 0x25b   :  { %v451_v25 = vmul.bf16 %v1479_v38, %v226_v18 }
 0x25c   :  { %v349_v24 = vpack.i.b16 %v310_v14, %v310_v14 }
 0x25e   :  { %559 = vadd.xlane.f32.xlu0 %v487_v23  ;;  %561 = vadd.xlane.f32.xlu1 %v488_v26  ;;  %v205_v23 = vld [vmem:[#allocation7 + $0x3c] sm:$0xf]  ;;  %v228_v26 = vld [vmem:[#allocation7 + $0x98] sm:$0xf]  ;;  %v354_v33 = vrot.slane %v349_v24, %v1451_v29  ;;  %v240_v24 = vld [vmem:[#allocation7 + $0xc8] sm:$0xf] }
 0x25f   :  { %v430_v30 = vmul.bf16 %v1467_v4, %v205_v23  ;;  %v453_v36 = vmul.bf16 %v1479_v38, %v228_v26  ;;  %v1213_v4 = vpack.i.b16 %v1501_v32, %v1501_v32  ;;  %v219_v26 = vld [vmem:[#allocation7 + $0x74] sm:$0xf] }
 0x260   :  { %v1508_v43 = vcombine.low %v354_v33, %v354_v33 }
 0x261   :  { %v494_v40 = vunpack.c.l.bf16 %v430_v30  ;;  %v517_v34 = vunpack.c.l.bf16 %v453_v36  ;;  %v233_v36 = vld [vmem:[#allocation7 + $0xac] sm:$0xf] }
 0x262   :  { %575 = vadd.xlane.f32.xlu0 %v495_v31  ;;  %563 = vadd.xlane.f32.xlu1 %v489_v35  ;;  %v213_v31 = vld [vmem:[#allocation7 + $0x5c] sm:$0xf]  ;;  %v515_v35 = vunpack.c.l.bf16 %v451_v25  ;;  %v439_v56 = vmul.bf16 %v1508_v43, %v214_v49  ;;  %v441_v60 = vmul.bf16 %v1508_v43, %v216_v52  ;;  %v442_v6 = vmul.bf16 %v1508_v43, %v217_v61  ;;  %v243_v52 = vld [vmem:[#allocation7 + $0xd4] sm:$0xf] }
 0x263   :  { %v438_v41 = vmul.bf16 %v1470_v13, %v213_v31  ;;  %v322_v13 = vrot.slane %v1213_v4, %v1451_v29  ;;  %v220_v31 = vld [vmem:[#allocation7 + $0x78] sm:$0xf]  ;;  %v241_v4 = vld [vmem:[#allocation7 + $0xcc] sm:$0xf]  ;;  %v221_v49 = vld [vmem:[#allocation7 + $0x7c] sm:$0xf] }
 0x264   :  { %v506_v14 = vunpack.c.l.bf16 %v442_v6  ;;  %v247_v6 = vld [vmem:[#allocation7 + $0xe4] sm:$0xf] }
 0x265   :  { %v502_v47 = vunpack.c.l.bf16 %v438_v41  ;;  %v234_v41 = vld [vmem:[#allocation7 + $0xb0] sm:$0xf] }
 0x266   :  { %579 = vadd.xlane.f32.xlu0 %v497_v39  ;;  %577 = vadd.xlane.f32.xlu1 %v496_v42  ;;  %v363_v39 = vpack.i.b16 %v318_v27, %v318_v27  ;;  %v227_v42 = vld [vmem:[#allocation7 + $0x94] sm:$0xf]  ;;  %v286_v27 = vunpack.i.h.s16 %v1501_v32 }
 0x268   :  { %v368_v46 = vrot.slane %v363_v39, %v1451_v29  ;;  %v294_v37 = vpack.i.b16 %v286_v27, %v286_v27 }
 0x26a   :  { %567 = vadd.xlane.f32.xlu0 %v491_v45  ;;  %565 = vadd.xlane.f32.xlu1 %v490_v48  ;;  %v215_v45 = vld [vmem:[#allocation7 + $0x64] sm:$0xf]  ;;  %v452_v48 = vmul.bf16 %v1479_v38, %v227_v42  ;;  %v1515_v53 = vcombine.low %v368_v46, %v368_v46  ;;  %v242_v46 = vld [vmem:[#allocation7 + $0xd0] sm:$0xf] }
 0x26c   :  { %v456_v63 = vmul.bf16 %v1515_v53, %v231_v57  ;;  %v457_v20 = vmul.bf16 %v1515_v53, %v232_v11  ;;  %v458_v32 = vmul.bf16 %v1515_v53, %v233_v36  ;;  %v235_v57 = vld [vmem:[#allocation7 + $0xb4] sm:$0xf] }
 0x26e   :  { %609 = vadd.xlane.f32.xlu0 %v512_v51  ;;  %581 = vadd.xlane.f32.xlu1 %v498_v55  ;;  %v440_v51 = vmul.bf16 %v1508_v43, %v215_v45  ;;  %v516_v55 = vunpack.c.l.bf16 %v452_v48  ;;  %v520_v8 = vunpack.c.l.bf16 %v456_v63  ;;  %v459_v45 = vmul.bf16 %v1515_v53, %v234_v41  ;;  %v236_v63 = vld [vmem:[#allocation7 + $0xb8] sm:$0xf]  ;;  %v253_v41 = vld [vmem:[#allocation7 + $0xfc] sm:$0xf] }
 0x270   :  { %v504_v38 = vunpack.c.l.bf16 %v440_v51 }
 0x272   :  { %569 = vadd.xlane.f32.xlu0 %v492_v59  ;;  %607 = vadd.xlane.f32.xlu1 %v511_v62  ;;  %v370_v59 = vpack.i.b16 %v322_v13, %v322_v13  ;;  %v503_v62 = vunpack.c.l.bf16 %v439_v56  ;;  %v446_v56 = vmul.bf16 %v1508_v43, %v221_v49 }
 0x274   :  { %v375_v3 = vrot.slane %v370_v59, %v1451_v29  ;;  %v510_v61 = vunpack.c.l.bf16 %v446_v56 }
 0x276   :  { %585 = vadd.xlane.f32.xlu0 %v500_v5  ;;  %583 = vadd.xlane.f32.xlu1 %v499_v10  ;;  %v505_v5 = vunpack.c.l.bf16 %v441_v60  ;;  %v443_v10 = vmul.bf16 %v1508_v43, %v218_v1  ;;  %v1523_v12 = vcombine.low %v375_v3, %v375_v3  ;;  %v237_v60 = vld [vmem:[#allocation7 + $0xbc] sm:$0xf] }
 0x278   :  { %v507_v18 = vunpack.c.l.bf16 %v443_v10  ;;  %v463_v23 = vmul.bf16 %v1523_v12, %v238_v17  ;;  %v465_v30 = vmul.bf16 %v1523_v12, %v240_v24  ;;  %v466_v48 = vmul.bf16 %v1523_v12, %v241_v4 }
 0x279   :  { %v467_v51 = vmul.bf16 %v1523_v12, %v242_v46 }
 0x27a   :  { %613 = vadd.xlane.f32.xlu0 %v514_v16  ;;  %611 = vadd.xlane.f32.xlu1 %v513_v21  ;;  %v455_v16 = vmul.bf16 %v1515_v53, %v230_v7  ;;  %v239_v21 = vld [vmem:[#allocation7 + $0xc4] sm:$0xf]  ;;  %v529_v39 = vunpack.c.l.bf16 %v465_v30  ;;  %v461_v7 = vmul.bf16 %v1515_v53, %v236_v63  ;;  %v249_v30 = vld [vmem:[#allocation7 + $0xec] sm:$0xf] }
 0x27b   :  { %v464_v25 = vmul.bf16 %v1523_v12, %v239_v21  ;;  %v531_v59 = vunpack.c.l.bf16 %v467_v51 }
 0x27c   :  { %v519_v22 = vunpack.c.l.bf16 %v455_v16  ;;  %v525_v16 = vunpack.c.l.bf16 %v461_v7 }
 0x27d   :  { %v528_v33 = vunpack.c.l.bf16 %v464_v25 }
 0x27e   :  { %587 = vadd.xlane.f32.xlu0 %v501_v54  ;;  %571 = vadd.xlane.f32.xlu1 %v493_v28  ;;  %v521_v54 = vunpack.c.l.bf16 %v457_v20  ;;  %v527_v28 = vunpack.c.l.bf16 %v463_v23 }
 0x282   :  { %615 = vadd.xlane.f32.xlu0 %v515_v35  ;;  %573 = vadd.xlane.f32.xlu1 %v494_v40  ;;  %v444_v35 = vmul.bf16 %v1508_v43, %v219_v26  ;;  %v445_v40 = vmul.bf16 %v1508_v43, %v220_v31  ;;  %v252_v26 = vld [vmem:[#allocation7 + $0xf8] sm:$0xf] }
 0x284   :  { %v508_v42 = vunpack.c.l.bf16 %v444_v35  ;;  %v509_v44 = vunpack.c.l.bf16 %v445_v40 }
 0x286   :  { %619 = vadd.xlane.f32.xlu0 %v517_v34  ;;  %589 = vadd.xlane.f32.xlu1 %v502_v47  ;;  %v326_v34 = vrot.slane %v294_v37, %v1451_v29  ;;  %v522_v47 = vunpack.c.l.bf16 %v458_v32  ;;  %v250_v37 = vld [vmem:[#allocation7 + $0xf0] sm:$0xf] }
 0x288   :  { %v377_v13 = vpack.i.b16 %v326_v34, %v326_v34  ;;  %v1121_v34 = vsel %vm122_vm0, %v1430_v0, 0.0  ;;  %vm1116_vm0 = vcmask 7168  }
 0x28a   :  { %621 = vadd.xlane.f32.xlu0 %v518_v50  ;;  %617 = vadd.xlane.f32.xlu1 %v516_v55  ;;  %v523_v50 = vunpack.c.l.bf16 %v459_v45  ;;  %v530_v55 = vunpack.c.l.bf16 %v466_v48  ;;  %v382_v58 = vrot.slane %v377_v13, %v1451_v29  ;;  %v1552_v45 = vld [vmem:[%s1754_s5] sm:$0xff] }
 0x28c   :  { %v1221_v1 = vcombine.low %v382_v58, %v382_v58 }
 0x28e   :  { %593 = vadd.xlane.f32.xlu0 %v504_v38  ;;  %591 = vadd.xlane.f32.xlu1 %v503_v62  ;;  %v468_v38 = vmul.bf16 %v1523_v12, %v243_v52  ;;  %v460_v62 = vmul.bf16 %v1515_v53, %v235_v57  ;;  %v472_v11 = vmul.bf16 %v1221_v1, %v247_v6 }
 0x28f   :  { %v474_v36 = vmul.bf16 %v1221_v1, %v249_v30  ;;  %v475_v40 = vmul.bf16 %v1221_v1, %v250_v37  ;;  %v478_v32 = vmul.bf16 %v1221_v1, %v253_v41 }
 0x290   :  { %v532_v3 = vunpack.c.l.bf16 %v468_v38  ;;  %v524_v43 = vunpack.c.l.bf16 %v460_v62  ;;  %v536_v20 = vunpack.c.l.bf16 %v472_v11 }
 0x291   :  { %v542_v4 = vunpack.c.l.bf16 %v478_v32 }
 0x292   :  { %595 = vadd.xlane.f32.xlu0 %v505_v5  ;;  %625 = vadd.xlane.f32.xlu1 %v520_v8  ;;  %v462_v5 = vmul.bf16 %v1515_v53, %v237_v60  ;;  %v244_v8 = vld [vmem:[#allocation7 + $0xd8] sm:$0xf] }
 0x293   :  { %v469_v17 = vmul.bf16 %v1523_v12, %v244_v8 }
 0x294   :  { %v526_v10 = vunpack.c.l.bf16 %v462_v5 }
 0x295   :  { %v533_v23 = vunpack.c.l.bf16 %v469_v17 }
 0x296   :  { %597 = vadd.xlane.f32.xlu0 %v506_v14  ;;  %599 = vadd.xlane.f32.xlu1 %v507_v18  ;;  %v248_v14 = vld [vmem:[#allocation7 + $0xe8] sm:$0xf]  ;;  %v245_v18 = vld [vmem:[#allocation7 + $0xdc] sm:$0xf] }
 0x297   :  { %v473_v21 = vmul.bf16 %v1221_v1, %v248_v14  ;;  %v470_v24 = vmul.bf16 %v1523_v12, %v245_v18  ;;  %v538_v12 = vunpack.c.l.bf16 %v474_v36 }
 0x299   :  { %v537_v53 = vunpack.c.l.bf16 %v473_v21  ;;  %v534_v27 = vunpack.c.l.bf16 %v470_v24 }
 0x29a   :  { %623 = vadd.xlane.f32.xlu0 %v519_v22  ;;  %627 = vadd.xlane.f32.xlu1 %v521_v54  ;;  %v251_v22 = vld [vmem:[#allocation7 + $0xf4] sm:$0xf]  ;;  %v246_v54 = vld [vmem:[#allocation7 + $0xe0] sm:$0xf] }
 0x29b   :  { %v476_v25 = vmul.bf16 %v1221_v1, %v251_v22 }
 0x29d   :  { %v540_v31 = vunpack.c.l.bf16 %v476_v25 }
 0x29e   :  { %639 = vadd.xlane.f32.xlu0 %v527_v28  ;;  %641 = vadd.xlane.f32.xlu1 %v528_v33  ;;  %v471_v28 = vmul.bf16 %v1221_v1, %v246_v54  ;;  %v477_v33 = vmul.bf16 %v1221_v1, %v252_v26 }
 0x2a0   :  { %v535_v35 = vunpack.c.l.bf16 %v471_v28 }
 0x2a2   :  { %643 = vadd.xlane.f32.xlu0 %v529_v39  ;;  %601 = vadd.xlane.f32.xlu1 %v508_v42  ;;  %v541_v39 = vunpack.c.l.bf16 %v477_v33  ;;  %v539_v42 = vunpack.c.l.bf16 %v475_v40 }
 0x2a6   :  { %603 = vadd.xlane.f32.xlu0 %v509_v44  ;;  %629 = vadd.xlane.f32.xlu1 %v522_v47  ;;  %v743_v44 = vand.u32 127, %v258_v15 }
 0x2a8   :  { %v748_v46 = vadd.s32 4294967288, %v743_v44  ;;  %v755_v47 = vadd.s32 4294967280, %v743_v44  ;;  %v762_v49 = vadd.s32 4294967272, %v743_v44  ;;  %v769_v51 = vadd.s32 4294967264, %v743_v44 }
 0x2a9   :  { %v776_v38 = vadd.s32 4294967256, %v743_v44 }
 0x2aa   :  { %631 = vadd.xlane.f32.xlu0 %v523_v50  ;;  %645 = vadd.xlane.f32.xlu1 %v530_v55  ;;  %v1556_v50 = vsub.s32 %v743_v44, %v1447_v19  ;;  %v1559_v0 = vsub.s32 %v748_v46, %v1447_v19  ;;  %v1562_v15 = vsub.s32 %v755_v47, %v1447_v19 }
 0x2ab   :  { %v1565_v55 = vsub.s32 %v762_v49, %v1447_v19  ;;  %v1579_v8 = vsub.s32 %v776_v38, %v1447_v19 }
 0x2ae   :  { %647 = vadd.xlane.f32.xlu0 %v531_v59  ;;  %605 = vadd.xlane.f32.xlu1 %v510_v61  ;;  %v1570_v59 = vsub.s32 %v769_v51, %v1447_v19  ;;  %v783_v61 = vadd.s32 4294967248, %v743_v44 }
 0x2b2   :  { %649 = vadd.xlane.f32.xlu0 %v532_v3  ;;  %633 = vadd.xlane.f32.xlu1 %v524_v43  ;;  %v790_v3 = vadd.s32 4294967240, %v743_v44 }
 0x2b6   :  { %637 = vadd.xlane.f32.xlu0 %v526_v10  ;;  %635 = vadd.xlane.f32.xlu1 %v525_v16  ;;  %v1582_v10 = vsub.s32 %v783_v61, %v1447_v19  ;;  %v1586_v16 = vsub.s32 %v790_v3, %v1447_v19 }
 0x2ba   :  { %657 = vadd.xlane.f32.xlu0 %v536_v20  ;;  %651 = vadd.xlane.f32.xlu1 %v533_v23 }
 0x2be   :  { %659 = vadd.xlane.f32.xlu0 %v537_v53  ;;  %653 = vadd.xlane.f32.xlu1 %v534_v27 }
 0x2c2   :  { %665 = vadd.xlane.f32.xlu0 %v540_v31  ;;  %655 = vadd.xlane.f32.xlu1 %v535_v35 }
 0x2c6   :  { %667 = vadd.xlane.f32.xlu0 %v541_v39  ;;  %661 = vadd.xlane.f32.xlu1 %v538_v12 }
 0x2ca   :  { %663 = vadd.xlane.f32.xlu1 %v539_v42 }
 0x2ce   :  { %669 = vadd.xlane.f32.xlu1 %v542_v4 }
 0x2d2   :  { %1122 = vadd.xlane.f32.xlu1 %v1121_v34 }
 0x2db   :  { %v548_v48 = vpop.xlane.xlu0 %547  ;;  %v544_v13 = vpop.xlane.xlu1 %543 }
 0x2dc   :  { %1105 = vperm.xlu0 %1244, %v1552_v45   ;;  %v747_v57 = vrot.slane %v544_v13, %v1556_v50  ;;  %v759_v60 = vrot.slane %v548_v48, %v1562_v15 }
 0x2df   :  { %v550_v52 = vpop.xlane.xlu0 %549  ;;  %v546_v56 = vpop.xlane.xlu1 %545 }
 0x2e0   :  { %v752_v58 = vrot.slane %v546_v56, %v1559_v0  ;;  %v766_v63 = vrot.slane %v550_v52, %v1565_v55 }
 0x2e2   :  { %v754_v1 = vsel %vm753_vm2, %v752_v58, %v747_v57 }
 0x2e3   :  { %v556_v62 = vpop.xlane.xlu0 %555  ;;  %v761_v5 = vsel %vm760_vm3, %v759_v60, %v754_v1  ;;  %v552_v6 = vpop.xlane.xlu1 %551 }
 0x2e4   :  { %v768_v43 = vsel %vm767_vm4, %v766_v63, %v761_v5  ;;  %v773_v7 = vrot.slane %v552_v6, %v1570_v59  ;;  %v787_v20 = vrot.slane %v556_v62, %v1582_v10 }
 0x2e6   :  { %v775_v14 = vsel %vm774_vm5, %v773_v7, %v768_v43 }
 0x2e7   :  { %v558_v11 = vpop.xlane.xlu0 %557  ;;  %v554_v17 = vpop.xlane.xlu1 %553 }
 0x2e8   :  { %v780_v18 = vrot.slane %v554_v17, %v1579_v8  ;;  %v794_v22 = vrot.slane %v558_v11, %v1586_v16 }
 0x2ea   :  { %v782_v23 = vsel %vm781_vm6, %v780_v18, %v775_v14 }
 0x2eb   :  { %v560_v21 = vpop.xlane.xlu0 %559  ;;  %v789_v54 = vsel %vm788_vm7, %v787_v20, %v782_v23  ;;  %v562_v53 = vpop.xlane.xlu1 %561 }
 0x2ec   :  { %v800_v24 = vrot.slane %v560_v21, %v1556_v50  ;;  %v804_v19 = vrot.slane %v562_v53, %v1559_v0  ;;  %v796_v25 = vsel %vm795_vm8, %v794_v22, %v789_v54 }
 0x2ee   :  { %v805_v27 = vsel %vm753_vm2, %v804_v19, %v800_v24 }
 0x2ef   :  { %v576_v26 = vpop.xlane.xlu0 %575  ;;  %v564_v28 = vpop.xlane.xlu1 %563 }
 0x2f0   :  { %v809_v30 = vrot.slane %v564_v28, %v1562_v15  ;;  %v839_v37 = vrot.slane %v576_v26, %v1556_v50 }
 0x2f2   :  { %v810_v33 = vsel %vm760_vm3, %v809_v30, %v805_v27 }
 0x2f3   :  { %v580_v31 = vpop.xlane.xlu0 %579  ;;  %v578_v35 = vpop.xlane.xlu1 %577 }
 0x2f4   :  { %v848_v36 = vrot.slane %v580_v31, %v1562_v15  ;;  %v843_v39 = vrot.slane %v578_v35, %v1559_v0 }
 0x2f6   :  { %v844_v40 = vsel %vm753_vm2, %v843_v39, %v839_v37 }
 0x2f7   :  { %v568_v12 = vpop.xlane.xlu0 %567  ;;  %v849_v41 = vsel %vm760_vm3, %v848_v36, %v844_v40  ;;  %v566_v42 = vpop.xlane.xlu1 %565 }
 0x2f8   :  { %v819_v32 = vrot.slane %v568_v12, %v1570_v59  ;;  %v814_v4 = vrot.slane %v566_v42, %v1565_v55 }
 0x2fa   :  { %v815_v44 = vsel %vm767_vm4, %v814_v4, %v810_v33 }
 0x2fb   :  { %v610_v34 = vpop.xlane.xlu0 %609  ;;  %v820_v46 = vsel %vm774_vm5, %v819_v32, %v815_v44  ;;  %v582_v47 = vpop.xlane.xlu1 %581 }
 0x2fc   :  { %v853_v48 = vrot.slane %v582_v47, %v1565_v55  ;;  %v921_v56 = vrot.slane %v610_v34, %v1559_v0 }
 0x2fe   :  { %v854_v13 = vsel %vm767_vm4, %v853_v48, %v849_v41 }
 0x2ff   :  { %v570_v49 = vpop.xlane.xlu0 %569  ;;  %v608_v52 = vpop.xlane.xlu1 %607 }
 0x300   :  { %v824_v51 = vrot.slane %v570_v49, %v1579_v8  ;;  %v917_v57 = vrot.slane %v608_v52, %v1556_v50 }
 0x302   :  { %v825_v58 = vsel %vm781_vm6, %v824_v51, %v820_v46  ;;  %v922_v60 = vsel %vm753_vm2, %v921_v56, %v917_v57 }
 0x303   :  { %v586_v38 = vpop.xlane.xlu0 %585  ;;  %v584_v61 = vpop.xlane.xlu1 %583 }
 0x304   :  { %v863_v62 = vrot.slane %v586_v38, %v1579_v8  ;;  %v858_v63 = vrot.slane %v584_v61, %v1570_v59 }
 0x306   :  { %v859_v3 = vsel %vm774_vm5, %v858_v63, %v854_v13 }
 0x307   :  { %v614_v1 = vpop.xlane.xlu0 %613  ;;  %v864_v5 = vsel %vm781_vm6, %v863_v62, %v859_v3  ;;  %v612_v6 = vpop.xlane.xlu1 %611 }
 0x308   :  { %v931_v43 = vrot.slane %v614_v1, %v1565_v55  ;;  %v926_v7 = vrot.slane %v612_v6, %v1562_v15 }
 0x30a   :  { %v927_v14 = vsel %vm760_vm3, %v926_v7, %v922_v60 }
 0x30b   :  { %v588_v11 = vpop.xlane.xlu0 %587  ;;  %v932_v18 = vsel %vm767_vm4, %v931_v43, %v927_v14  ;;  %v572_v20 = vpop.xlane.xlu1 %571 }
 0x30c   :  { %v868_v17 = vrot.slane %v588_v11, %v1582_v10  ;;  %v829_v21 = vrot.slane %v572_v20, %v1582_v10 }
 0x30e   :  { %v869_v22 = vsel %vm788_vm7, %v868_v17, %v864_v5  ;;  %v830_v24 = vsel %vm788_vm7, %v829_v21, %v825_v58 }
 0x30f   :  { %v616_v23 = vpop.xlane.xlu0 %615  ;;  %v574_v54 = vpop.xlane.xlu1 %573 }
 0x310   :  { %v834_v53 = vrot.slane %v574_v54, %v1586_v16  ;;  %v936_v52 = vrot.slane %v616_v23, %v1570_v59 }
 0x312   :  { %v835_v26 = vsel %vm795_vm8, %v834_v53, %v830_v24  ;;  %v937_v63 = vsel %vm774_vm5, %v936_v52, %v932_v18 }
 0x313   :  { %v620_v19 = vpop.xlane.xlu0 %619  ;;  %v1071_v27 = vsel %vm1070_vm9, %v835_v26, %v796_v25  ;;  %v590_v28 = vpop.xlane.xlu1 %589 }
 0x314   :  { %v873_v30 = vrot.slane %v590_v28, %v1586_v16  ;;  %v946_v7 = vrot.slane %v620_v19, %v1582_v10 }
 0x316   :  { %v874_v33 = vsel %vm795_vm8, %v873_v30, %v869_v22 }
 0x317   :  { %v622_v31 = vpop.xlane.xlu0 %621  ;;  %v1073_v35 = vsel %vm1072_vm10, %v874_v33, %v1071_v27  ;;  %v618_v36 = vpop.xlane.xlu1 %617 }
 0x318   :  { %v941_v57 = vrot.slane %v618_v36, %v1579_v8  ;;  %v951_v21 = vrot.slane %v622_v31, %v1586_v16 }
 0x31a   :  { %v942_v5 = vsel %vm781_vm6, %v941_v57, %v937_v63 }
 0x31b   :  { %v594_v37 = vpop.xlane.xlu0 %593  ;;  %v592_v39 = vpop.xlane.xlu1 %591  ;;  %v947_v17 = vsel %vm788_vm7, %v946_v7, %v942_v5 }
 0x31c   :  { %v882_v48 = vrot.slane %v594_v37, %v1559_v0  ;;  %v878_v49 = vrot.slane %v592_v39, %v1556_v50  ;;  %v952_v54 = vsel %vm795_vm8, %v951_v21, %v947_v17 }
 0x31e   :  { %v883_v38 = vsel %vm753_vm2, %v882_v48, %v878_v49 }
 0x31f   :  { %v596_v12 = vpop.xlane.xlu0 %595  ;;  %v626_v40 = vpop.xlane.xlu1 %625 }
 0x320   :  { %v887_v13 = vrot.slane %v596_v12, %v1562_v15  ;;  %v960_v39 = vrot.slane %v626_v40, %v1559_v0 }
 0x322   :  { %v888_v60 = vsel %vm760_vm3, %v887_v13, %v883_v38 }
 0x323   :  { %v598_v41 = vpop.xlane.xlu0 %597  ;;  %v600_v42 = vpop.xlane.xlu1 %599 }
 0x324   :  { %v892_v56 = vrot.slane %v598_v41, %v1565_v55  ;;  %v897_v61 = vrot.slane %v600_v42, %v1570_v59 }
 0x326   :  { %v893_v1 = vsel %vm767_vm4, %v892_v56, %v888_v60 }
 0x327   :  { %v624_v32 = vpop.xlane.xlu0 %623  ;;  %v628_v4 = vpop.xlane.xlu1 %627  ;;  %v898_v11 = vsel %vm774_vm5, %v897_v61, %v893_v1 }
 0x328   :  { %v956_v31 = vrot.slane %v624_v32, %v1556_v50  ;;  %v965_v12 = vrot.slane %v628_v4, %v1562_v15  ;;  %v1251_v32 = vpop.eup %1250 }
 0x329   :  { %v1119_v56 = vmul.f32 0.6931472, %v1251_v32 }
 0x32a   :  { %v961_v41 = vsel %vm753_vm2, %v960_v39, %v956_v31 }
 0x32b   :  { %v1631_v34 = vpop.xlane.xlu0 %639  ;;  %v642_v25 = vpop.xlane.xlu1 %641  ;;  %v966_v4 = vsel %vm760_vm3, %v965_v12, %v961_v41 }
 0x32c   :  { %v995_v42 = vrot.slane %v1631_v34, %v1556_v50 }
 0x32f   :  { %v1633_v44 = vpop.xlane.xlu0 %643  ;;  %v602_v46 = vpop.xlane.xlu1 %601 }
 0x330   :  { %v902_v3 = vrot.slane %v602_v46, %v1579_v8  ;;  %v1004_v9 = vrot.slane %v1633_v44, %v1562_v15 }
 0x332   :  { %v903_v20 = vsel %vm781_vm6, %v902_v3, %v898_v11 }
 0x333   :  { %v604_v47 = vpop.xlane.xlu0 %603  ;;  %v630_v51 = vpop.xlane.xlu1 %629 }
 0x334   :  { %v907_v6 = vrot.slane %v604_v47, %v1582_v10  ;;  %v970_v47 = vrot.slane %v630_v51, %v1565_v55 }
 0x336   :  { %v908_v22 = vsel %vm788_vm7, %v907_v6, %v903_v20  ;;  %v1120_v20 = vadd.f32 %v1119_v56, %v1434_v2 }
 0x337   :  { %v632_v58 = vpop.xlane.xlu0 %631  ;;  %v1644_v62 = vpop.xlane.xlu1 %645 }
 0x338   :  { %v975_v48 = vrot.slane %v632_v58, %v1570_v59  ;;  %v1009_v34 = vrot.slane %v1644_v62, %v1565_v55  ;;  %v971_v58 = vsel %vm767_vm4, %v970_v47, %v966_v4  ;;  %v1124_v31 = vmul.f32 16.0, %v1120_v20 }
 0x33a   :  { %v976_v38 = vsel %vm774_vm5, %v975_v48, %v971_v58 }
 0x33b   :  { %v1651_v43 = vpop.xlane.xlu0 %647  ;;  %v606_v14 = vpop.xlane.xlu1 %605 }
 0x33c   :  { %v912_v18 = vrot.slane %v606_v14, %v1586_v16 }
 0x33e   :  { %v913_v24 = vsel %vm795_vm8, %v912_v18, %v908_v22  ;;  %v189_v22 = vld [vmem:[%s1753_s4] sm:$0x1]  ;;  %s1361_s4 = smov [#allocation9]  }
 0x33f   :  { %v650_v23 = vpop.xlane.xlu0 %649  ;;  %v1075_v53 = vsel %vm1074_vm11, %v913_v24, %v1073_v35  ;;  %v634_v19 = vpop.xlane.xlu1 %633  ;;  %v999_v35 = vrot.slane %v642_v25, %v1559_v0  ;;  %v671_v32 = vand.u32 2147483647, %v189_v22  ;;  %s1166_s30 = sshll.u32 %s1361_s4, 4  ;;  %s1167_s30 = int_to_ptr.vmem [resolvable:$true] %s1166_s30 }
 0x340   :  { %v1662_v26 = vsel %vm1076_vm12, %v952_v54, %v1075_v53  ;;  %v980_v13 = vrot.slane %v634_v19, %v1579_v8  ;;  %v1019_v60 = vrot.slane %v650_v23, %v1579_v8  ;;  %s1301_s12 = scalar_lea.vmem %s1167_s30, 128  ;;  %p1306_p3 = scmp.lt.s32.totalorder %s1167_s30, %s1167_s30 }
 0x341   :  { %v1000_v25 = vsel %vm753_vm2, %v999_v35, %v995_v42  ;;  %v1256_v42 = vld [vmem:[#allocation2] sm:$0xff]  ;;  %v1100_v4 = vrot.slane %v671_v32, %v1451_v29  ;;  %p1302_p2 = scmp.ne.s32.totalorder %s1167_s30, %s1301_s12  ;;  %p1307_p4 = scmp.lt.s32.totalorder %s1301_s12, %s1301_s12 }
 0x342   :  { %v1005_v57 = vsel %vm760_vm3, %v1004_v9, %v1000_v25  ;;  %v981_v63 = vsel %vm781_vm6, %v980_v13, %v976_v38 }
 0x343   :  { %v638_v27 = vpop.xlane.xlu0 %637  ;;  %v636_v28 = vpop.xlane.xlu1 %635  ;;  %v1010_v5 = vsel %vm767_vm4, %v1009_v34, %v1005_v57  ;;  %p1308_p5 = por %p1307_p4, %p1306_p3 }
 0x344   :  { %v985_v52 = vrot.slane %v636_v28, %v1582_v10  ;;  %v676_v28 = vrot.slane %v189_v22, %v1451_v29 }
 0x345   :  { %p1309_p6 = pnand %p1308_p5, %p1302_p2 }
 0x346   :  { %v986_v6 = vsel %vm788_vm7, %v985_v52, %v981_v63 }
 0x347   :  { %v658_v30 = vpop.xlane.xlu0 %657  ;;  %v652_v33 = vpop.xlane.xlu1 %651 }
 0x348   :  { %v1038_v44 = vrot.slane %v658_v30, %v1559_v0  ;;  %v990_v0 = vrot.slane %v638_v27, %v1586_v16  ;;  %v1024_v1 = vrot.slane %v652_v33, %v1582_v10 }
 0x34a   :  { %v991_v23 = vsel %vm795_vm8, %v990_v0, %v986_v6 }
 0x34b   :  { %v654_v36 = vpop.xlane.xlu1 %653  ;;  %v660_v37 = vpop.xlane.xlu0 %659  ;;  %v1079_v30 = vsel %vm1078_vm13, %v991_v23, %v1662_v26 }
 0x34c   :  { %v1043_v3 = vrot.slane %v660_v37, %v1562_v15 }
 0x34f   :  { %v656_v46 = vpop.xlane.xlu1 %655  ;;  %v666_v49 = vpop.xlane.xlu0 %665 }
 0x350   :  { %v1034_v40 = vrot.slane %v656_v46, %v1556_v50  ;;  %v1014_v50 = vrot.slane %v1651_v43, %v1570_v59  ;;  %v1029_v43 = vrot.slane %v654_v36, %v1586_v16  ;;  %v1058_v15 = vrot.slane %v666_v49, %v1579_v8 }
 0x352   :  { %v1039_v61 = vsel %vm753_vm2, %v1038_v44, %v1034_v40  ;;  %v1015_v14 = vsel %vm774_vm5, %v1014_v50, %v1010_v5 }
 0x353   :  { %v662_v51 = vpop.xlane.xlu1 %661  ;;  %v668_v7 = vpop.xlane.xlu0 %667  ;;  %v1020_v18 = vsel %vm781_vm6, %v1019_v60, %v1015_v14 }
 0x354   :  { %v1048_v62 = vrot.slane %v662_v51, %v1565_v55  ;;  %v1044_v55 = vsel %vm760_vm3, %v1043_v3, %v1039_v61  ;;  %v1025_v24 = vsel %vm788_vm7, %v1024_v1, %v1020_v18  ;;  %v1063_v54 = vrot.slane %v668_v7, %v1582_v10 }
 0x355   :  { %v1030_v2 = vsel %vm795_vm8, %v1029_v43, %v1025_v24 }
 0x356   :  { %v1049_v21 = vsel %vm767_vm4, %v1048_v62, %v1044_v55  ;;  %v1081_v33 = vsel %vm1080_vm14, %v1030_v2, %v1079_v30 }
 0x357   :  { %v664_v11 = vpop.xlane.xlu1 %663 }
 0x358   :  { %v1053_v17 = vrot.slane %v664_v11, %v1570_v59 }
 0x35a   :  { %v1054_v59 = vsel %vm774_vm5, %v1053_v17, %v1049_v21 }
 0x35b   :  { %v1059_v53 = vsel %vm781_vm6, %v1058_v15, %v1054_v59  ;;  %v670_v8 = vpop.xlane.xlu1 %669  ;;  %v1106_v25 = vpop.permute.xlu0 %1105 }
 0x35c   :  { %v1064_v19 = vsel %vm788_vm7, %v1063_v54, %v1059_v53  ;;  %v1068_v27 = vrot.slane %v670_v8, %v1586_v16 }
 0x35e   :  { %v1069_v10 = vsel %vm795_vm8, %v1068_v27, %v1064_v19 }
 0x35f   :  { %v1083_v36 = vsel %vm1082_vm15, %v1069_v10, %v1081_v33  ;;  %v1123_v37 = vpop.xlane.xlu1 %1122 }
 0x360   :  { %v1125_v39 = vsub.f32 %v1123_v37, %v1124_v31  ;;  %v1085_v12 = vmul.f32 %v1083_v36, %v676_v28 }
 0x362   :  { %v1126_v41 = vmul.f32 %v1125_v39, %v1552_v45  ;;  %v1087_v35 = vand.u32 2147483647, %v1085_v12  ;;  %v1086_v49 = vmin.f32 %v1085_v12, 0.0 }
 0x364   :  { %v1129_v46 = vadd.f32 %v1256_v42, %v1126_v41  ;;  %v1088_v16 = vsub.f32 0.0, %v1087_v35 }
 0x366   :  { %1130 = vst.msk [vmem:[#allocation3] sm:$0xff] %vm1116_vm0, %v1129_v46  ;;  %v1089_v9 = vmul.f32 1.442695, %v1088_v16 }
 0x368   :  { %1252 = vpow2.f32 %v1089_v9 }
 0x36d   :  { %v1145_v58 = vld [vmem:[#allocation3] sm:$0xff] }
 0x372   :  { %v1253_v26 = vpop.eup %1252 }
 0x373   :  { %v1091_v47 = vadd.f32 1.0, %v1253_v26 }
 0x375   :  { %1254 = vlog2.f32 %v1091_v47 }
 0x37f   :  { %v1255_v48 = vpop.eup %1254 }
 0x380   :  { %v1093_v40 = vmul.f32 0.6931472, %v1255_v48 }
 0x382   :  { %v1094_v13 = vsub.f32 %v1086_v49, %v1093_v40 }
 0x384   :  { %v1095_v45 = vmax.f32 %v1094_v13, -20.723267 }
 0x386   :  { %v1102_v34 = vmul.f32 %v1100_v4, %v1095_v45 }
 0x388   :  { %v1108_v52 = vmul.f32 %v1106_v25, %v1102_v34 }
 0x38a   :  { %v1112_v44 = vsel %vm1111_vm1, %v1108_v52, 0.0 }
 0x38b   :  { %1113 = vadd.xlane.f32.xlu1 %v1112_v44 }
 0x418   :  { %v1114_v51 = vpop.xlane.xlu1 %1113 }
 0x419   :  { %v1115_v56 = vadd.f32 %v1256_v42, %v1114_v51 }
 0x41b   :  { %1117 = vst.msk [vmem:[#allocation2] sm:$0xff] %vm1116_vm0, %v1115_v56 }
 0x422   :  { %v1134_v57 = vld [vmem:[#allocation2] sm:$0xff] }
 0x423   :  { %1135 = vadd.xlane.f32.xlu1 %v1134_v57 }
 0x427   :  { %1146 = vadd.xlane.f32.xlu1 %v1145_v58 }
 0x4b0   :  { %v1136_v50 = vpop.xlane.xlu1 %1135 }
 0x4b1   :  { %v1137_v38 = vrot.slane %v1136_v50, 4 }
 0x4b3   :  { %v1138_v60 = vadd.f32 %v1137_v38, %v1136_v50 }
 0x4b4   :  { %v1147_v29 = vpop.xlane.xlu1 %1146 }
 0x4b5   :  { %v1139_v61 = vrot.slane %v1138_v60, 2  ;;  %v1148_v62 = vrot.slane %v1147_v29, 4 }
 0x4b7   :  { %v1149_v63 = vadd.f32 %v1148_v62, %v1147_v29  ;;  %v1140_v0 = vadd.f32 %v1139_v61, %v1138_v60 }
 0x4b9   :  { %v1150_v1 = vrot.slane %v1149_v63, 2  ;;  %v1141_v3 = vrot.slane %v1140_v0, 1 }
 0x4bb   :  { %v1151_v5 = vadd.f32 %v1150_v1, %v1149_v63  ;;  %v1142_v6 = vadd.f32 %v1141_v3, %v1140_v0 }
 0x4bd   :  { %1230 = vpush %v1142_v6  ;;  %v1152_v43 = vrot.slane %v1151_v5, 1 }
 0x4bf   :  { %v1153_v7 = vadd.f32 %v1152_v43, %v1151_v5 }
 0x4c1   :  { %1232 = vpush %v1153_v7 }
 0x4ee   :  { %s1231_s8 = spop %1230 }
 0x4ef   :  { %v1144_v11 = vstv %s1231_s8 }
 0x4f0   :  { %v1156_v14 = vsub.f32 0.0, %v1144_v11 }
 0x4f2   :  { %1157 = vst [vmem:[#allocation9] sm:$0xff] %v1156_v14  ;;  %s1233_s11 = spop %1232 }
 0x4f3   :  { %v1155_v55 = vstv %s1233_s11 }
 0x4f4   :  { %1312 = shalt.err (!%p1309_p6)
}
 0x4f5   :  { %s1313_s15 = scalar_lea.hbm %s1755_s6, 128 }
 0x4f6   :  { %p1314_p7 = scmp.ne.s32.totalorder %s1755_s6, %s1313_s15  ;;  %p1317_p8 = scmp.lt.u32.totalorder %s1313_s15, %s1755_s6 }
 0x4f8   :  { %p1319_p9 = pnand %p1317_p8, %p1314_p7 }
 0x4fa   :  { %1322 = shalt.err (!%p1319_p9)
}
 0x4fb   :  { %1169 = dma.vmem_to_hbm [thread:$0]  %s1167_s30, 128, %s1755_s6, [#allocation6]   ;;  %v1158_v17 = vmul.f32 93.75, %v1155_v55 }
 0x4fc   :  { %s1323_s22 = scalar_lea.vmem %s1177_s10, 128  ;;  %p1328_p11 = scmp.lt.s32.totalorder %s1177_s10, %s1177_s10 }
 0x4fd   :  { %1159 = vst [vmem:[#allocation10] sm:$0xff] %v1158_v17  ;;  %p1324_p10 = scmp.ne.s32.totalorder %s1177_s10, %s1323_s22  ;;  %p1329_p12 = scmp.lt.s32.totalorder %s1323_s22, %s1323_s22 }
 0x4ff   :  { %p1330_p13 = por %p1329_p12, %p1328_p11 }
 0x501   :  { %p1331_p0 = pnand %p1330_p13, %p1324_p10 }
 0x503   :  { %1334 = shalt.err (!%p1331_p0)
}
 0x504   :  { %s1335_s1 = scalar_lea.hbm %s1756_s7, 128 }
 0x505   :  { %p1336_p1 = scmp.ne.s32.totalorder %s1756_s7, %s1335_s1  ;;  %p1339_p2 = scmp.lt.u32.totalorder %s1335_s1, %s1756_s7 }
 0x507   :  { %p1341_p3 = pnand %p1339_p2, %p1336_p1 }
 0x509   :  { %1344 = shalt.err (!%p1341_p3)
}
 0x50a   :  { %1179 = dma.vmem_to_hbm [thread:$0]  %s1177_s10, 128, %s1756_s7, [#allocation11]  }
 0x50b   :  { %1349 = dma.done.wait [#allocation6], 128  }
 0x50c   :  { %1350 = vsyncadd [#allocation6], 4294967168 }
 0x50d   :  { %1351 = dma.done.wait [#allocation11], 128  }
 0x50e   :  { %1352 = vsyncadd [#allocation11], 4294967168 }
 0x50f   :  { %1186 = vsyncpa [#allocation5], 1 }
 0x510   :  { %1187 = vsyncpa [#allocation8], 1 }
 0x511   :  { %1188 = vsyncpa [#allocation6], 1 }
 0x512   :  { %1189 = vsyncpa [#allocation11], 1 }

</bundles_post_ra>
